<compile_context>
chip_gen: v5e
topology: v5e:2x2
jax: 0.10.0
libtpu: 0.0.40
codegen_flags: <defaults>
</compile_context>

<pallas_src>
import functools

import jax
import jax.numpy as jnp
from jax import lax
from jax.experimental import pallas as pl
from jax.experimental.pallas import tpu as pltpu


def _round_up(n, m):
    return ((n + m - 1) // m) * m


def _tom_kernel(x_ref, w1_ref, b1_ref, w2_ref, b2_ref, out_ref, *, num_intention):
    x = x_ref[...]

    # Linear 1 + ReLU (MXU matmul, f32 accumulation; biases kept in f32).
    h = jnp.dot(x, w1_ref[...], preferred_element_type=jnp.float32) + b1_ref[...]
    h = jnp.maximum(h, 0.0)

    # Linear 2 (cast activations back to the weight dtype for the MXU).
    out = jnp.dot(h.astype(w2_ref.dtype), w2_ref[...],
                  preferred_element_type=jnp.float32) + b2_ref[...]

    # Masked softmax over the first `num_intention` lanes only; remaining lanes
    # (predicted belief) pass through untouched. Single lane-dense store.
    lane = lax.broadcasted_iota(jnp.int32, out.shape, 1)
    is_int = lane < num_intention

    logits = jnp.where(is_int, out, -jnp.inf)
    m = jnp.max(logits, axis=1, keepdims=True)
    e = jnp.exp(logits - m)                      # exp(-inf) = 0 on belief lanes
    denom = jnp.sum(e, axis=1, keepdims=True)
    sm = e / denom                               # exact normalization; kernel is
                                                 # DMA-bound, not EUP-bound.

    out_ref[...] = jnp.where(is_int, sm, out).astype(out_ref.dtype)


def _tom_forward_xla(x, w1, b1, w2, b2, num_intention):
    """Plain XLA fusion for tiny batches where pallas_call dispatch dominates."""
    h = jnp.maximum(x @ w1 + b1.reshape(1, -1), 0.0)
    out = h @ w2 + b2.reshape(1, -1)
    return jax.nn.softmax(out[:, :num_intention], axis=1), out[:, num_intention:]


def _choose_block_b(batch, max_tile=4096):
    """Batch tile: whole batch for small problems; otherwise at least 2 grid
    steps (so v7x's two TensorCores both engage) capped at `max_tile` rows
    (keeps per-step DMA >= ~0.4 MiB so the ~0.35 us/step overhead amortizes)."""
    if batch <= 256:
        return batch
    return min(max_tile, _round_up((batch + 1) // 2, 8))


def tom_forward(initial_states, result_states, beliefs, action_emb,
                w1, b1, w2, b2, *, num_intention,
                compute_dtype=jnp.bfloat16, block_b=None, force_pallas=False):
    """Concat in the wrapper (lane-dense input), run the fused MLP+softmax
    kernel over a 1-D parallel batch grid, slice the two outputs outside."""
    assert num_intention >= 1, "num_intention must be >= 1 (softmax over 0 lanes is NaN)"

    x = jnp.concatenate(
        [initial_states, result_states, beliefs, action_emb], axis=1
    ).astype(jnp.float32)

    batch, in_dim = x.shape
    hid = w1.shape[1]
    out_dim = w2.shape[1]

    # At tiny batches dispatch/DMA setup dwarfs the compute; let XLA fuse it.
    if batch < 128 and not force_pallas:
        return _tom_forward_xla(x, w1, b1, w2, b2, num_intention)

    # bf16 (default) halves the dominant x HBM traffic; matmuls still accumulate
    # in f32. Biases stay f32 (added post-matmul).
    xc = x.astype(compute_dtype)
    w1c = w1.astype(compute_dtype)
    w2c = w2.astype(compute_dtype)
    b1c = b1.reshape(1, hid).astype(jnp.float32)
    b2c = b2.reshape(1, out_dim).astype(jnp.float32)

    if block_b is None:
        block_b = _choose_block_b(batch)
    block_b = max(8, _round_up(block_b, 8)) if block_b < batch else batch

    # Pad batch to a multiple of block_b (zero rows; sliced off afterwards) so
    # pipelining / dual-TC behavior is deterministic for awkward batch sizes.
    padded_batch = _round_up(batch, block_b)
    if padded_batch != batch:
        xc = jnp.pad(xc, ((0, padded_batch - batch), (0, 0)))
    grid = (padded_batch // block_b,)

    kernel = functools.partial(_tom_kernel, num_intention=num_intention)

    x_item = jnp.dtype(compute_dtype).itemsize
    flops = 2 * padded_batch * in_dim * hid + 2 * padded_batch * hid * out_dim
    bytes_accessed = (padded_batch * in_dim * x_item
                      + (in_dim * hid + hid * out_dim) * x_item
                      + (hid + out_dim) * 4
                      + padded_batch * out_dim * 4)

    # Double-buffered in/out tiles + resident weights. Only override the scoped
    # VMEM limit if a user-supplied block_b would blow past v5e's 16 MiB default.
    vmem_est = (2 * block_b * (in_dim * x_item + out_dim * 4)
                + (in_dim * hid + hid * out_dim) * x_item
                + (hid + out_dim) * 4)
    cp_kwargs = {"dimension_semantics": ("parallel",)}
    if vmem_est > 12 * 1024 * 1024:
        cp_kwargs["vmem_limit_bytes"] = int(vmem_est * 2)

    out = pl.pallas_call(
        kernel,
        out_shape=jax.ShapeDtypeStruct((padded_batch, out_dim), jnp.float32),
        grid_spec=pltpu.PrefetchScalarGridSpec(
            num_scalar_prefetch=0,
            grid=grid,
            in_specs=[
                pl.BlockSpec((block_b, in_dim), lambda i: (i, 0)),   # x tile
                pl.BlockSpec((in_dim, hid), lambda i: (0, 0)),       # W1 (resident)
                pl.BlockSpec((1, hid), lambda i: (0, 0)),            # b1
                pl.BlockSpec((hid, out_dim), lambda i: (0, 0)),      # W2
                pl.BlockSpec((1, out_dim), lambda i: (0, 0)),        # b2
            ],
            out_specs=pl.BlockSpec((block_b, out_dim), lambda i: (i, 0)),
        ),
        compiler_params=pltpu.CompilerParams(**cp_kwargs),
        cost_estimate=pl.CostEstimate(
            flops=flops,
            transcendentals=padded_batch * out_dim,
            bytes_accessed=bytes_accessed),
    )(xc, w1c, b1c, w2c, b2c)

    # Slicing pad rows / splitting outputs outside the kernel is free in XLA.
    out = out[:batch]
    intention = out[:, :num_intention]
    pred_belief = out[:, num_intention:]
    return intention, pred_belief


def init_params(key, emb_dim_state, emb_dim_belief, num_moves,
                num_intention, hidden_dim_tom):
    """Deterministic synthetic parameter init (shapes match the nn.Linear layers)."""
    in_dim = emb_dim_state * 2 + emb_dim_belief + num_moves
    hid = hidden_dim_tom * 4
    out_dim = num_intention + emb_dim_belief

    k1, k2, k3, k4 = jax.random.split(key, 4)
    # Stored as [in, out] (transpose of torch's [out, in] weight).
    w1 = jax.random.normal(k1, (in_dim, hid), jnp.float32) * 0.1
    b1 = jax.random.normal(k2, (1, hid), jnp.float32) * 0.1
    w2 = jax.random.normal(k3, (hid, out_dim), jnp.float32) * 0.1
    b2 = jax.random.normal(k4, (1, out_dim), jnp.float32) * 0.1
    return w1, b1, w2, b2


def _reference(initial_states, result_states, beliefs, action_emb,
               w1, b1, w2, b2, num_intention):
    x = jnp.concatenate([initial_states, result_states, beliefs, action_emb], axis=1)
    h = jnp.maximum(x @ w1 + b1, 0.0)
    out = h @ w2 + b2
    return jax.nn.softmax(out[:, :num_intention], axis=1), out[:, num_intention:]


if __name__ == "__main__":
    # Small shapes consistent with the module.
    emb_dim_state = 16
    emb_dim_belief = 8
    num_moves = 8
    num_intention = 8
    hidden_dim_tom = 8

    key = jax.random.PRNGKey(0)
    kp, kd = jax.random.split(key, 2)
    w1, b1, w2, b2 = init_params(
        kp, emb_dim_state, emb_dim_belief, num_moves, num_intention, hidden_dim_tom
    )

    def make_inputs(k, batch):
        ki, kr, kb, ka = jax.random.split(k, 4)
        return (jax.random.normal(ki, (batch, emb_dim_state), jnp.float32),
                jax.random.normal(kr, (batch, emb_dim_state), jnp.float32),
                jax.random.normal(kb, (batch, emb_dim_belief), jnp.float32),
                # action_emb participates in a float concat in the reference module.
                jax.random.normal(ka, (batch, num_moves), jnp.float32))

    # --- Test 1: tiny batch, force the Pallas path, f32 compute (tight tol). ---
    batch = 8
    ins = make_inputs(kd, batch)
    intention, pred_belief = tom_forward(
        *ins, w1, b1, w2, b2, num_intention=num_intention,
        compute_dtype=jnp.float32, force_pallas=True)
    jax.block_until_ready((intention, pred_belief))
    ref_int, ref_bel = _reference(*ins, w1, b1, w2, b2, num_intention)
    assert intention.shape == (batch, num_intention)
    assert pred_belief.shape == (batch, emb_dim_belief)
    assert jnp.allclose(intention, ref_int, atol=1e-5, rtol=1e-5)
    assert jnp.allclose(pred_belief, ref_bel, atol=1e-5, rtol=1e-5)

    # --- Test 2: non-divisible batch, default bf16 compute, multi-step grid. ---
    batch2 = 1000
    ins2 = make_inputs(jax.random.PRNGKey(1), batch2)
    intention2, pred_belief2 = tom_forward(
        *ins2, w1, b1, w2, b2, num_intention=num_intention)
    jax.block_until_ready((intention2, pred_belief2))
    ref_int2, ref_bel2 = _reference(*ins2, w1, b1, w2, b2, num_intention)
    assert intention2.shape == (batch2, num_intention)
    assert pred_belief2.shape == (batch2, emb_dim_belief)
    # bf16 inputs/weights -> looser tolerance vs f32 reference.
    assert jnp.allclose(intention2, ref_int2, atol=2e-2, rtol=2e-2)
    assert jnp.allclose(pred_belief2, ref_bel2, atol=3e-2, rtol=3e-2)
    # Exact softmax normalization: rows sum to 1.
    assert jnp.allclose(jnp.sum(intention2, axis=1), 1.0, atol=1e-5)

    print("KERNEL_OK")
</pallas_src>

<mosaic_0001>
module attributes {stable_mosaic.version = 11 : i64} {
  func.func @_tom_kernel(%arg0: i32, %arg1: memref<8x48xf32, #tpu.memory_space<vmem>>, %arg2: memref<48x32xf32, #tpu.memory_space<vmem>>, %arg3: memref<1x32xf32, #tpu.memory_space<vmem>>, %arg4: memref<32x16xf32, #tpu.memory_space<vmem>>, %arg5: memref<1x16xf32, #tpu.memory_space<vmem>>, %arg6: memref<8x16xf32, #tpu.memory_space<vmem>>) attributes {dimension_semantics = [#tpu.dimension_semantics<parallel>], iteration_bounds = array<i64: 1>, scalar_prefetch = 0 : i64, scratch_operands = 0 : i64, tpu.core_type = #tpu.core_type<tc>, window_params = [{transform_indices = @transform_0, window_bounds = array<i64: 8, 48>}, {pipeline_mode = #tpu.pipeline_mode<synchronous>, transform_indices = @transform_1, window_bounds = array<i64: 48, 32>}, {pipeline_mode = #tpu.pipeline_mode<synchronous>, transform_indices = @transform_2, window_bounds = array<i64: 1, 32>}, {pipeline_mode = #tpu.pipeline_mode<synchronous>, transform_indices = @transform_3, window_bounds = array<i64: 32, 16>}, {pipeline_mode = #tpu.pipeline_mode<synchronous>, transform_indices = @transform_4, window_bounds = array<i64: 1, 16>}, {transform_indices = @transform_5, window_bounds = array<i64: 8, 16>}]} {
    %c0 = arith.constant 0 : index
    %c0_0 = arith.constant 0 : index
    %0 = vector.load %arg1[%c0, %c0_0] : memref<8x48xf32, #tpu.memory_space<vmem>>, vector<8x48xf32>
    %c0_1 = arith.constant 0 : index
    %c0_2 = arith.constant 0 : index
    %1 = vector.load %arg2[%c0_1, %c0_2] : memref<48x32xf32, #tpu.memory_space<vmem>>, vector<48x32xf32>
    %cst = arith.constant dense<0.000000e+00> : vector<8x32xf32>
    %2 = tpu.matmul %0, %1, %cst {dimension_numbers = #tpu.dot_dimension_numbers<[1], [0], [0], [1], [0, 0, 1, 1], [], []>} : vector<8x48xf32>, vector<48x32xf32>, vector<8x32xf32> -> vector<8x32xf32>
    %c0_3 = arith.constant 0 : index
    %c0_4 = arith.constant 0 : index
    %3 = vector.load %arg3[%c0_3, %c0_4] : memref<1x32xf32, #tpu.memory_space<vmem>>, vector<1x32xf32>
    %4 = vector.broadcast %3 : vector<1x32xf32> to vector<8x32xf32>
    %5 = arith.addf %2, %4 : vector<8x32xf32>
    %cst_5 = arith.constant 0.000000e+00 : f32
    %6 = vector.broadcast %cst_5 : f32 to vector<8x32xf32>
    %7 = arith.maximumf %5, %6 : vector<8x32xf32>
    %c0_6 = arith.constant 0 : index
    %c0_7 = arith.constant 0 : index
    %8 = vector.load %arg4[%c0_6, %c0_7] : memref<32x16xf32, #tpu.memory_space<vmem>>, vector<32x16xf32>
    %cst_8 = arith.constant dense<0.000000e+00> : vector<8x16xf32>
    %9 = tpu.matmul %7, %8, %cst_8 {dimension_numbers = #tpu.dot_dimension_numbers<[1], [0], [0], [1], [0, 0, 1, 1], [], []>} : vector<8x32xf32>, vector<32x16xf32>, vector<8x16xf32> -> vector<8x16xf32>
    %c0_9 = arith.constant 0 : index
    %c0_10 = arith.constant 0 : index
    %10 = vector.load %arg5[%c0_9, %c0_10] : memref<1x16xf32, #tpu.memory_space<vmem>>, vector<1x16xf32>
    %11 = vector.broadcast %10 : vector<1x16xf32> to vector<8x16xf32>
    %12 = arith.addf %9, %11 : vector<8x16xf32>
    %13 = tpu.iota {dimensions = array<i32: 1>} : vector<8x16xi32>
    %c8_i32 = arith.constant 8 : i32
    %14 = vector.broadcast %c8_i32 : i32 to vector<8x16xi32>
    %15 = arith.cmpi slt, %13, %14 : vector<8x16xi32>
    %cst_11 = arith.constant 0xFF800000 : f32
    %16 = vector.broadcast %cst_11 : f32 to vector<8x16xf32>
    %17 = arith.select %15, %12, %16 : vector<8x16xi1>, vector<8x16xf32>
    %cst_12 = arith.constant dense<0xFF800000> : vector<8xf32>
    %18 = vector.multi_reduction <maximumf>, %17, %cst_12 [1] : vector<8x16xf32> to vector<8xf32>
    %19 = vector.shape_cast %18 : vector<8xf32> to vector<8x1xf32>
    %20 = vector.broadcast %19 : vector<8x1xf32> to vector<8x16xf32>
    %21 = arith.subf %17, %20 : vector<8x16xf32>
    %22 = math.exp %21 : vector<8x16xf32>
    %cst_13 = arith.constant dense<0.000000e+00> : vector<8xf32>
    %23 = vector.multi_reduction <add>, %22, %cst_13 [1] : vector<8x16xf32> to vector<8xf32>
    %24 = vector.shape_cast %23 : vector<8xf32> to vector<8x1xf32>
    %25 = vector.broadcast %24 : vector<8x1xf32> to vector<8x16xf32>
    %26 = arith.divf %22, %25 : vector<8x16xf32>
    %27 = arith.select %15, %26, %12 : vector<8x16xi1>, vector<8x16xf32>
    %c0_14 = arith.constant 0 : index
    %c0_15 = arith.constant 0 : index
    %28 = vector.load %arg6[%c0_14, %c0_15] : memref<8x16xf32, #tpu.memory_space<vmem>>, vector<8x16xf32>
    tpu.vector_store %arg6[%c0_14, %c0_15], %27 {strides = array<i32>} : memref<8x16xf32, #tpu.memory_space<vmem>>, vector<8x16xf32>,
    return
  }
  func.func @transform_0(%arg0: i32) -> (i32, i32) {
    %c0_i32 = arith.constant 0 : i32
    %c0_i32_0 = arith.constant 0 : i32
    return %arg0, %c0_i32 : i32, i32
  }
  func.func @transform_1(%arg0: i32) -> (i32, i32) {
    %c0_i32 = arith.constant 0 : i32
    %c0_i32_0 = arith.constant 0 : i32
    %c0_i32_1 = arith.constant 0 : i32
    return %c0_i32, %c0_i32_0 : i32, i32
  }
  func.func @transform_2(%arg0: i32) -> (i32, i32) {
    %c0_i32 = arith.constant 0 : i32
    %c0_i32_0 = arith.constant 0 : i32
    %c0_i32_1 = arith.constant 0 : i32
    return %c0_i32, %c0_i32_0 : i32, i32
  }
  func.func @transform_3(%arg0: i32) -> (i32, i32) {
    %c0_i32 = arith.constant 0 : i32
    %c0_i32_0 = arith.constant 0 : i32
    %c0_i32_1 = arith.constant 0 : i32
    return %c0_i32, %c0_i32_0 : i32, i32
  }
  func.func @transform_4(%arg0: i32) -> (i32, i32) {
    %c0_i32 = arith.constant 0 : i32
    %c0_i32_0 = arith.constant 0 : i32
    %c0_i32_1 = arith.constant 0 : i32
    return %c0_i32, %c0_i32_0 : i32, i32
  }
  func.func @transform_5(%arg0: i32) -> (i32, i32) {
    %c0_i32 = arith.constant 0 : i32
    %c0_i32_0 = arith.constant 0 : i32
    return %arg0, %c0_i32 : i32, i32
  }
}

</mosaic_0001>

<bundles_post_ra>
// kernel: tpu_custom_call.1
= control target key start
LH: loop header
LB: loop body
LE: loop exit
PB: predicated region body
PF: predicated region fallthrough
CT: control target
= control target key end

     0   :  { %s249_s0 = inlined_call_operand.vmem [shape: f32[8,48], index: 0, kind: input, shape index: {}]   ;;  %s250_s1 = inlined_call_operand.vmem [shape: f32[48,32], index: 1, kind: input, shape index: {}]   ;;  %s251_s2 = inlined_call_operand.vmem [shape: f32[1,32], index: 2, kind: input, shape index: {}]   ;;  %s252_s3 = inlined_call_operand.vmem [shape: f32[32,16], index: 3, kind: input, shape index: {}]   ;;  %s253_s4 = inlined_call_operand.vmem [shape: f32[1,16], index: 4, kind: input, shape index: {}]   ;;  %s254_s5 = inlined_call_operand.hbm [shape: f32[8,16], index: 5, kind: output, shape index: {}]  }
   0x1   :  { %v27_v0 = vld [vmem:[%s250_s1 + $0x28] sm:$0xff]  ;;  %v26_v1 = vld [vmem:[%s250_s1 + $0x20] sm:$0xff]  ;;  %v25_v2 = vld [vmem:[%s250_s1 + $0x18] sm:$0xff] }
   0x2   :  { %46 = vmatpush.msra.mxu0 %v27_v0  ;;  %v60_v3 = vld [vmem:[%s252_s3 + $0x18] sm:$0xff] }
   0x3   :  { %81 = vmatpush.msra.mxu1 %v60_v3 }
   0x4   :  { %47 = vmatpush.msra.mxu0 %v26_v1 }
   0x5   :  { %10 = vsyncpa [#allocation3], 0  ;;  %v24_v4 = vld [vmem:[%s250_s1 + $0x10] sm:$0xff]  ;;  %v23_v5 = vld [vmem:[%s250_s1 + $0x8] sm:$0xff]  ;;  %vm32_vm0 = vcmask 392192   ;;  %vm65_vm1 = vcmask 261120   ;;  %v89_v15 = vlaneseq }
   0x6   :  { %48 = vmatpush.msra.mxu0 %v25_v2  ;;  %v22_v6 = vld [vmem:[%s250_s1] sm:$0xff]  ;;  %v59_v8 = vld [vmem:[%s252_s3 + $0x10] sm:$0xff]  ;;  %v58_v9 = vld [vmem:[%s252_s3 + $0x8] sm:$0xff]  ;;  %vm93_vm3 = vcmask 130048   ;;  %s127_s18 = sshll.u32 %s254_s5, 4  ;;  %s128_s18 = int_to_ptr.hbm [resolvable:$true] %s127_s18 }
   0x7   :  { %v21_v7 = vld [vmem:[%s249_s0] sm:$0xff]  ;;  %82 = vmatpush.msra.mxu1 %v59_v8  ;;  %v90_v16 = vand.u32 127, %v89_v15 }
   0x8   :  { %49 = vmatpush.msra.mxu0 %v24_v4  ;;  %v57_v10 = vld [vmem:[%s252_s3] sm:$0xff] }
   0x9   :  { %83 = vmatpush.msra.mxu1 %v58_v9  ;;  %v139_v11 = vld [vmem:[%s251_s2] ss:$0 sm:$0xff]  ;;  %vm91_vm2 = vcmp.lt.s32.totalorder %v90_v16, 8  ;;  %s171_s2 = smov [#allocation2]  }
   0xa   :  { %50 = vmatpush.msra.mxu0 %v23_v5  ;;  %v140_v17 = vld [vmem:[%s253_s4] ss:$0 sm:$0xff]  ;;  %s125_s3 = sshll.u32 %s171_s2, 4  ;;  %s126_s3 = int_to_ptr.vmem [resolvable:$true] %s125_s3 }
   0xb   :  { %84 = vmatpush.msra.mxu1 %v57_v10 }
   0xc   :  { %51 = vmatpush.msra.mxu0 %v22_v6 }
   0xd   :  { %136 = vmatmul.msk.f32.vlgmr.msra.gmra.mxu0 %vm32_vm0, %v21_v7 }
  0x8a   :  { %v53_v12 = vpop.f32.mrf.mxu0 }
  0x8b   :  { %v54_v13 = vadd.f32 %v139_v11, %v53_v12 }
  0x8d   :  { %v56_v14 = vmax.f32 %v54_v13, 0.0 }
  0x8f   :  { %137 = vmatmul.msk.f32.vlgmr.msra.gmra.mxu1 %vm65_vm1, %v56_v14 }
 0x10c   :  { %v86_v18 = vpop.f32.mrf.mxu1 }
 0x10d   :  { %v87_v19 = vadd.f32 %v140_v17, %v86_v18 }
 0x10f   :  { %v92_v20 = vsel %vm91_vm2, %v87_v19, -inf }
 0x110   :  { %v94_v21 = vsel %vm93_vm3, %v92_v20, -inf }
 0x111   :  { %95 = vmax.xlane.f32.xlu0 %v94_v21 }
 0x184   :  { %v96_v22 = vpop.xlane.xlu0 %95 }
 0x185   :  { %v97_v23 = vsub.f32 %v92_v20, %v96_v22 }
 0x187   :  { %v98_v24 = vmul.f32 1.442695, %v97_v23 }
 0x189   :  { %141 = vpow2.f32 %v98_v24 }
 0x18f   :  { %v142_v25 = vpop.eup %141 }
 0x190   :  { %v100_v26 = vsel %vm93_vm3, %v142_v25, 0.0 }
 0x191   :  { %101 = vadd.xlane.f32.xlu0 %v100_v26 }
 0x204   :  { %v102_v27 = vpop.xlane.xlu0 %101 }
 0x205   :  { %143 = vrcp.f32 %v102_v27  ;;  %v114_v31 = vand.u32 2147483648, %v102_v27  ;;  %v112_v33 = vand.u32 2147483647, %v102_v27  ;;  %vm108_vm5 = vweird.f32 %v102_v27 }
 0x207   :  { %v115_v35 = vor.u32 1.1754944e-38, %v114_v31  ;;  %vm113_vm7 = vcmp.eq.f32.partialorder %v112_v33, 8.507059e+37 }
 0x20b   :  { %v144_v28 = vpop.eup %143 }
 0x20c   :  { %v104_v29 = vmul.f32 %v144_v28, %v102_v27  ;;  %vm109_vm4 = vweird.f32 %v144_v28 }
 0x20d   :  { %vm110_vm6 = vmor %vm108_vm5, %vm109_vm4 }
 0x20e   :  { %v105_v30 = vsub.f32 1.0, %v104_v29 }
 0x210   :  { %v106_v32 = vmul.f32 %v144_v28, %v105_v30 }
 0x212   :  { %v107_v34 = vadd.f32 %v144_v28, %v106_v32 }
 0x214   :  { %v111_v36 = vsel %vm110_vm6, %v144_v28, %v107_v34 }
 0x215   :  { %v116_v37 = vsel %vm113_vm7, %v115_v35, %v111_v36 }
 0x216   :  { %v117_v38 = vmul.f32 %v142_v25, %v116_v37 }
 0x218   :  { %v118_v39 = vsel %vm91_vm2, %v117_v38, %v87_v19 }
 0x219   :  { %119 = vst.msk [vmem:[#allocation2] sm:$0xff] %vm93_vm3, %v118_v39 }
 0x21a   :  { %130 = dma.vmem_to_hbm [thread:$0]  %s126_s3, 128, %s128_s18, [#allocation3]  }
 0x21b   :  { %169 = dma.done.wait [#allocation3], 128  }
 0x21c   :  { %170 = vsyncadd [#allocation3], 4294967168 }
 0x21d   :  { %135 = vsyncpa [#allocation3], 1 }

</bundles_post_ra>
